<compile_context>
chip_gen: v5e
topology: v5e:2x2
jax: 0.10.0
libtpu: 0.0.40
codegen_flags: <defaults>
</compile_context>

<pallas_src>
import functools
import math

import numpy as np
import jax
import jax.numpy as jnp
from jax.experimental import pallas as pl
from jax.experimental.pallas import tpu as pltpu


def bitreversal_permutation(n):
    """NumPy re-implementation of the PyTorch helper (deterministic)."""
    log_n = int(math.log2(n))
    assert n == 1 << log_n, "n must be a power of 2"
    perm = np.arange(n).reshape(n, 1)
    for _ in range(log_n):
        n1 = perm.shape[0] // 2
        perm = np.hstack((perm[:n1], perm[n1:]))
    return perm.squeeze(0)


def _col_permute_kernel(x_ref, pcol_ref, o_ref):
    # x_ref:    (C*H, W)  row-permuted, channel-flattened image
    # pcol_ref: (W, W)    0/1 column-permutation matrix (pcol[colperm[j], j]=1)
    # o_ref:    (C*H, W)
    # One MXU pass + one full-tile store; exact for finite inputs
    # (each output element = one input value * 1.0 accumulated with zeros).
    o_ref[...] = jnp.dot(
        x_ref[...], pcol_ref[...], preferred_element_type=jnp.float32
    ).astype(o_ref.dtype)


@functools.lru_cache(maxsize=None)
def _build_permute_fn(C, H, W, dtype_name, rowperm_t, colperm_t):
    """Build & jit the full pipeline once per (shape, dtype, permutation)."""
    dtype = jnp.dtype(dtype_name)
    rowperm_np = np.asarray(rowperm_t, dtype=np.int32)
    colperm_np = np.asarray(colperm_t, dtype=np.int32)

    # Column-permutation matrix: out[:, j] = in[:, colperm[j]]
    #   => pcol[colperm[j], j] = 1.  Built in x.dtype (0/1 entries -> exact).
    pcol_np = np.zeros((W, W), dtype=np.float32)
    pcol_np[colperm_np, np.arange(W)] = 1.0
    pcol = jnp.asarray(pcol_np, dtype=dtype)  # baked constant under jit

    call = pl.pallas_call(
        _col_permute_kernel,
        out_shape=jax.ShapeDtypeStruct((C * H, W), dtype),
        in_specs=[
            pl.BlockSpec(memory_space=pltpu.MemorySpace.VMEM),
            pl.BlockSpec(memory_space=pltpu.MemorySpace.VMEM),
        ],
        out_specs=pl.BlockSpec(memory_space=pltpu.MemorySpace.VMEM),
    )

    @jax.jit
    def fn(x):
        # Row (sublane) permutation fused into the packing gather; the reshape
        # (C, H, W) -> (C*H, W) is a free contiguous view change.
        xp = x[:, rowperm_np, :].reshape(C * H, W)
        out_packed = call(xp, pcol)
        return out_packed.reshape(C, H, W)

    return fn


def row_col_permute(x, rowperm, colperm):
    """x: (C, 32, 32) float image. Returns x[:, rowperm][:, :, colperm]."""
    C, H, W = x.shape
    rowperm_np = np.asarray(rowperm, dtype=np.int64)
    colperm_np = np.asarray(colperm, dtype=np.int64)
    assert H == rowperm_np.shape[0] and W == colperm_np.shape[0]
    assert jnp.issubdtype(x.dtype, jnp.floating)
    # TODO(synk): for integer (e.g. uint8) inputs, use a gather/copy path for
    # the column permute instead of the MXU (no integer MXU path on v7x).

    fn = _build_permute_fn(
        int(C), int(H), int(W), jnp.dtype(x.dtype).name,
        tuple(int(r) for r in rowperm_np),
        tuple(int(c) for c in colperm_np),
    )
    return fn(x)


if __name__ == "__main__":
    # Deterministic permutations (module __init__): bit-reversal of 32.
    rowperm = bitreversal_permutation(32)
    colperm = bitreversal_permutation(32)

    # Deterministic input consistent with the forward: per-sample (C, 32, 32).
    key = jax.random.PRNGKey(0)
    x = jax.random.normal(key, (3, 32, 32), dtype=jnp.float32)

    out = jax.block_until_ready(row_col_permute(x, rowperm, colperm))

    # Reference (pure JAX gather, matches PyTorch advanced indexing).
    ref = x[:, jnp.asarray(rowperm)][:, :, jnp.asarray(colperm)]
    assert out.shape == ref.shape and out.dtype == ref.dtype
    np.testing.assert_allclose(np.asarray(out), np.asarray(ref), rtol=0, atol=0)
    print("KERNEL_OK")
</pallas_src>

<mosaic_0001>
module attributes {stable_mosaic.version = 11 : i64} {
  func.func @_col_permute_kernel(%arg0: memref<96x32xf32, #tpu.memory_space<vmem>>, %arg1: memref<32x32xf32, #tpu.memory_space<vmem>>, %arg2: memref<96x32xf32, #tpu.memory_space<vmem>>) attributes {dimension_semantics = [], scalar_prefetch = 0 : i64, scratch_operands = 0 : i64, tpu.core_type = #tpu.core_type<tc>} {
    %c0 = arith.constant 0 : index
    %c0_0 = arith.constant 0 : index
    %0 = vector.load %arg0[%c0, %c0_0] : memref<96x32xf32, #tpu.memory_space<vmem>>, vector<96x32xf32>
    %c0_1 = arith.constant 0 : index
    %c0_2 = arith.constant 0 : index
    %1 = vector.load %arg1[%c0_1, %c0_2] : memref<32x32xf32, #tpu.memory_space<vmem>>, vector<32x32xf32>
    %cst = arith.constant dense<0.000000e+00> : vector<96x32xf32>
    %2 = tpu.matmul %0, %1, %cst {dimension_numbers = #tpu.dot_dimension_numbers<[1], [0], [0], [1], [0, 0, 1, 1], [], []>} : vector<96x32xf32>, vector<32x32xf32>, vector<96x32xf32> -> vector<96x32xf32>
    %c0_3 = arith.constant 0 : index
    %c0_4 = arith.constant 0 : index
    %3 = vector.load %arg2[%c0_3, %c0_4] : memref<96x32xf32, #tpu.memory_space<vmem>>, vector<96x32xf32>
    tpu.vector_store %arg2[%c0_3, %c0_4], %2 {strides = array<i32>} : memref<96x32xf32, #tpu.memory_space<vmem>>, vector<96x32xf32>,
    return
  }
}

</mosaic_0001>

<bundles_post_ra>
// kernel: fn.1
= control target key start
LH: loop header
LB: loop body
LE: loop exit
PB: predicated region body
PF: predicated region fallthrough
CT: control target
= control target key end

     0   :  { %vm28_vm0 = vcmask 261120   ;;  %s294_s0 = inlined_call_operand.vmem [shape: f32[96,32], index: 0, kind: input, shape index: {}]   ;;  %s295_s1 = inlined_call_operand.vmem [shape: f32[32,32], index: 1, kind: input, shape index: {}]   ;;  %s296_s2 = inlined_call_operand.hbm [shape: f32[96,32], index: 2, kind: output, shape index: {}]  }
   0x1   :  { %v27_v0 = vld [vmem:[%s295_s1 + $0x18] sm:$0xff]  ;;  %v26_v1 = vld [vmem:[%s295_s1 + $0x10] sm:$0xff]  ;;  %v25_v2 = vld [vmem:[%s295_s1 + $0x8] sm:$0xff] }
   0x2   :  { %161 = vmatpush.msra.mxu2 %v27_v0  ;;  %162 = vmatpush.msra.mxu3 %v27_v0  ;;  %v24_v3 = vld [vmem:[%s295_s1] sm:$0xff]  ;;  %v18_v4 = vld [vmem:[%s294_s0 + $0x30] sm:$0xff]  ;;  %v21_v5 = vld [vmem:[%s294_s0 + $0x48] sm:$0xff] }
   0x3   :  { %77 = vmatpush.msra.mxu0 %v27_v0  ;;  %160 = vmatpush.msra.mxu1 %v27_v0 }
   0x4   :  { %164 = vmatpush.msra.mxu2 %v26_v1  ;;  %165 = vmatpush.msra.mxu3 %v26_v1 }
   0x5   :  { %78 = vmatpush.msra.mxu0 %v26_v1  ;;  %163 = vmatpush.msra.mxu1 %v26_v1 }
   0x6   :  { %167 = vmatpush.msra.mxu2 %v25_v2  ;;  %168 = vmatpush.msra.mxu3 %v25_v2 }
   0x7   :  { %7 = vsyncpa [#allocation3], 0  ;;  %79 = vmatpush.msra.mxu0 %v25_v2  ;;  %166 = vmatpush.msra.mxu1 %v25_v2  ;;  %v12_v6 = vld [vmem:[%s294_s0] sm:$0xff]  ;;  %v15_v7 = vld [vmem:[%s294_s0 + $0x18] sm:$0xff]  ;;  %s136_s15 = sshll.u32 %s296_s2, 4  ;;  %s202_s16 = smov 128   ;;  %s137_s15 = int_to_ptr.hbm [resolvable:$true] %s136_s15 }
   0x8   :  { %170 = vmatpush.msra.mxu2 %v24_v3  ;;  %171 = vmatpush.msra.mxu3 %v24_v3  ;;  %v19_v8 = vld [vmem:[%s294_s0 + $0x38] sm:$0xff]  ;;  %v22_v9 = vld [vmem:[%s294_s0 + $0x50] sm:$0xff]  ;;  %v13_v10 = vld [vmem:[%s294_s0 + $0x8] sm:$0xff]  ;;  %s203_s17 = smov 8  }
   0x9   :  { %154 = vmatmul.msk.f32.vlgmr.msra.gmra.mxu2 %vm28_vm0, %v18_v4  ;;  %157 = vmatmul.msk.f32.vlgmr.msra.gmra.mxu3 %vm28_vm0, %v21_v5  ;;  %v16_v11 = vld [vmem:[%s294_s0 + $0x20] sm:$0xff]  ;;  %v23_v13 = vld [vmem:[%s294_s0 + $0x58] sm:$0xff]  ;;  %v14_v14 = vld [vmem:[%s294_s0 + $0x10] sm:$0xff] }
   0xa   :  { %80 = vmatpush.msra.mxu0 %v24_v3  ;;  %169 = vmatpush.msra.mxu1 %v24_v3  ;;  %v20_v12 = vld [vmem:[%s294_s0 + $0x40] sm:$0xff]  ;;  %v17_v15 = vld [vmem:[%s294_s0 + $0x28] sm:$0xff]  ;;  %s201_s0 = smov [#allocation2]  }
   0xb   :  { %148 = vmatmul.msk.f32.vlgmr.msra.gmra.mxu0 %vm28_vm0, %v12_v6  ;;  %151 = vmatmul.msk.f32.vlgmr.msra.gmra.mxu1 %vm28_vm0, %v15_v7  ;;  %s134_s12 = sshll.u32 %s201_s0, 4  ;;  %s135_s12 = int_to_ptr.vmem [resolvable:$true] %s134_s12 }
  0x11   :  { %155 = vmatmul.msk.f32.gmra.mxu2 %vm28_vm0, %v19_v8  ;;  %158 = vmatmul.msk.f32.gmra.mxu3 %vm28_vm0, %v22_v9 }
  0x13   :  { %149 = vmatmul.msk.f32.gmra.mxu0 %vm28_vm0, %v13_v10  ;;  %152 = vmatmul.msk.f32.gmra.mxu1 %vm28_vm0, %v16_v11 }
  0x19   :  { %156 = vmatmul.msk.f32.gmra.mxu2 %vm28_vm0, %v20_v12  ;;  %159 = vmatmul.msk.f32.gmra.mxu3 %vm28_vm0, %v23_v13 }
  0x1b   :  { %150 = vmatmul.msk.f32.gmra.mxu0 %vm28_vm0, %v14_v14  ;;  %153 = vmatmul.msk.f32.gmra.mxu1 %vm28_vm0, %v17_v15 }
  0x88   :  { %v82_v16 = vpop.f32.mrf.mxu0  ;;  %v91_v17 = vpop.f32.mrf.mxu1 }
  0x89   :  { %118 = vst.msk [vmem:[#allocation2] sm:$0xff] %vm28_vm0, %v82_v16 }
  0x8a   :  { %121 = vst.msk [vmem:[#allocation2 + $0x18] sm:$0xff] %vm28_vm0, %v91_v17 }
  0x8c   :  { %v100_v18 = vpop.f32.mrf.mxu2  ;;  %v109_v19 = vpop.f32.mrf.mxu3 }
  0x8d   :  { %124 = vst.msk [vmem:[#allocation2 + $0x30] sm:$0xff] %vm28_vm0, %v100_v18 }
  0x8e   :  { %127 = vst.msk [vmem:[#allocation2 + $0x48] sm:$0xff] %vm28_vm0, %v109_v19 }
  0x90   :  { %v85_v20 = vpop.f32.mrf.mxu0  ;;  %v94_v21 = vpop.f32.mrf.mxu1 }
  0x91   :  { %119 = vst.msk [vmem:[#allocation2 + $0x8] sm:$0xff] %vm28_vm0, %v85_v20 }
  0x92   :  { %122 = vst.msk [vmem:[#allocation2 + $0x20] sm:$0xff] %vm28_vm0, %v94_v21 }
  0x94   :  { %v103_v22 = vpop.f32.mrf.mxu2  ;;  %v112_v23 = vpop.f32.mrf.mxu3 }
  0x95   :  { %125 = vst.msk [vmem:[#allocation2 + $0x38] sm:$0xff] %vm28_vm0, %v103_v22 }
  0x96   :  { %128 = vst.msk [vmem:[#allocation2 + $0x50] sm:$0xff] %vm28_vm0, %v112_v23 }
  0x98   :  { %v88_v24 = vpop.f32.mrf.mxu0  ;;  %v97_v25 = vpop.f32.mrf.mxu1 }
  0x99   :  { %120 = vst.msk [vmem:[#allocation2 + $0x10] sm:$0xff] %vm28_vm0, %v88_v24 }
  0x9a   :  { %123 = vst.msk [vmem:[#allocation2 + $0x28] sm:$0xff] %vm28_vm0, %v97_v25 }
  0x9c   :  { %v106_v26 = vpop.f32.mrf.mxu2  ;;  %v115_v27 = vpop.f32.mrf.mxu3 }
  0x9d   :  { %126 = vst.msk [vmem:[#allocation2 + $0x40] sm:$0xff] %vm28_vm0, %v106_v26 }
  0x9e   :  { %129 = vst.msk [vmem:[#allocation2 + $0x58] sm:$0xff] %vm28_vm0, %v115_v27 }
  0x9f   :  { %142 = dma.vmem_to_hbm [thread:$0]  %s135_s12, 1536, %s137_s15, [#allocation3], %s202_s16, %s202_s16, %s203_s17  }
  0xa0   :  { %199 = dma.done.wait [#allocation3], 1536  }
  0xa1   :  { %200 = vsyncadd [#allocation3], 4294965760 }
  0xa2   :  { %147 = vsyncpa [#allocation3], 1 }

</bundles_post_ra>
